<compile_context>
chip_gen: v6e
topology: v6e:2x2x1
jax: 0.10.0
libtpu: 0.0.40
codegen_flags: <defaults>
</compile_context>

<pallas_src>
import functools

import jax
import jax.numpy as jnp
from jax import lax
from jax.experimental import pallas as pl
from jax.experimental.pallas import tpu as pltpu


def _focal_loss_kernel(logits_ref, labels_ref, out_ref, *, gamma):
    """One grid step = one (tb, C) tile of rows for one core-split.

    Grid = (num_splits [parallel], steps_per_split [arbitrary]).
    out_ref is a (1, 8, C) per-class / per-sublane partial-sum accumulator
    resident across the arbitrary axis (one block per core-split).
    """
    i = pl.program_id(1)

    @pl.when(i == 0)
    def _():
        out_ref[...] = jnp.zeros_like(out_ref)

    x = logits_ref[...].astype(jnp.float32)   # (tb, C)
    y = labels_ref[...].astype(jnp.float32)   # (tb, C)

    # Numerically stable softmax pieces along the class (lane) axis.
    m = jnp.max(x, axis=-1, keepdims=True)            # (tb, 1)  XLU
    shifted = x - m
    e = jnp.exp(shifted)                              # (tb, C)  the ONLY per-elem exp
    sum_e = jnp.sum(e, axis=-1, keepdims=True)        # (tb, 1)  XLU
    log_prob = shifted - jnp.log(sum_e)               # per-row log only

    # Focal factor (1 - p)^gamma without a second per-element exp:
    #   p = e / sum_e  =>  1 - p = (sum_e - e) / sum_e.
    # Exact reciprocal keeps the result bit-close to the exp(log_prob) ref.
    r = pl.reciprocal(sum_e, approx=False)            # (tb, 1)
    q = (sum_e - e) * r                               # (tb, C)

    if gamma == 2.0:
        mod = q * q                                   # pure VPU
    elif float(gamma) == int(gamma) and gamma >= 0:
        mod = lax.integer_pow(q, int(gamma))          # repeated multiplies
    else:
        mod = q ** gamma                              # general (EUP) fallback

    contrib = y * (mod * log_prob)                    # (tb, C); negated in wrapper

    # Fold rows into one sublane tile with pure vreg adds (no per-step XLU
    # sublane reduce); the final 8->1 and cross-lane reduce happen once in
    # the wrapper.
    tb, C = contrib.shape
    partial8 = jnp.sum(contrib.reshape(tb // 8, 8, C), axis=0)   # (8, C)
    out_ref[...] += partial8[None]                               # (1, 8, C)


def _round_up(x, m):
    return ((x + m - 1) // m) * m


# Per-input / per-pipeline-buffer tile budget.  Double-buffered: 2 inputs x
# 2 buffers x 6 MiB = 24 MiB of input VMEM -- large enough to sit at the HBM
# roofline on every generation, small enough for v7x's 64 MiB-per-TC VMEM.
_TILE_BYTES_PER_INPUT = 6 * 1024 * 1024
# Require at least this many pipelined steps per core before splitting the
# reduction across two TensorCores (otherwise the DMA is fully exposed).
_MIN_STEPS_PER_SPLIT = 3


def focal_loss_with_logits(logits, labels, *, gamma=2.0, block_rows=None):
    """Pallas equivalent of FocalLossWithLogits.forward (reduction='mean').

    Inputs are consumed in their native dtype (pass bf16 only if the data is
    already bf16 upstream -- casting here would add HBM traffic, not remove
    it); the kernel computes and accumulates in f32 regardless.
    """
    assert logits.shape == labels.shape, (logits.shape, labels.shape)
    C = logits.shape[-1]

    logits2d = logits.reshape(-1, C)
    labels2d = labels.reshape(-1, C)
    B = logits2d.shape[0]               # true number of rows (for the mean)
    C_pad = _round_up(C, 128)           # VMEM lane padding

    # ---- Row alignment: sublane tile of the narrowest input dtype. --------
    it_l = jnp.dtype(logits2d.dtype).itemsize
    it_y = jnp.dtype(labels2d.dtype).itemsize
    row_align = max(8, 32 // min(it_l, it_y))   # 8 f32 / 16 bf16 / 32 int8

    # ---- Tile-size selection: bytes-capped, not row-capped. ---------------
    if block_rows is None:
        tb = _TILE_BYTES_PER_INPUT // (max(it_l, it_y) * C_pad)
    else:
        tb = int(block_rows)
    tb = max(row_align, (tb // row_align) * row_align)
    tb = min(tb, _round_up(B, row_align))

    # ---- Split across (up to) 2 TensorCores only when it's worth it. ------
    steps_total = -(-B // tb)
    num_splits = 2 if steps_total >= 2 * _MIN_STEPS_PER_SPLIT else 1
    steps_per_split = -(-steps_total // num_splits)
    B_pad = num_splits * steps_per_split * tb

    # ---- Pad rows; zero labels => exactly zero loss contribution. ---------
    if B_pad != B:
        pad = B_pad - B
        logits2d = jnp.pad(logits2d, ((0, pad), (0, 0)))
        labels2d = jnp.pad(labels2d, ((0, pad), (0, 0)))

    # ---- VMEM limit sized to the real footprint; fits all generations. ----
    footprint = 2 * (it_l + it_y) * tb * C_pad      # double-buffered inputs
    vmem_limit = int(min(40 << 20, max(16 << 20, footprint + (12 << 20))))

    kernel = functools.partial(_focal_loss_kernel, gamma=gamma)
    row_map = lambda p, i: (p * steps_per_split + i, 0)

    # TODO(synk): for C << 128, lane-pack multiple rows per vreg (segmented
    # max/sum) to raise VPU/EUP occupancy in compute-bound configurations.
    partials = pl.pallas_call(
        kernel,
        out_shape=jax.ShapeDtypeStruct((num_splits, 8, C), jnp.float32),
        grid_spec=pltpu.PrefetchScalarGridSpec(
            num_scalar_prefetch=0,
            grid=(num_splits, steps_per_split),
            in_specs=[
                pl.BlockSpec((tb, C), row_map),
                pl.BlockSpec((tb, C), row_map),
            ],
            out_specs=pl.BlockSpec((1, 8, C), lambda p, i: (p, 0, 0)),
        ),
        compiler_params=pltpu.CompilerParams(
            dimension_semantics=("parallel", "arbitrary"),
            vmem_limit_bytes=vmem_limit,
        ),
    )(logits2d, labels2d)

    # Final cross-sublane / cross-lane / cross-split reduce + mean over the
    # true (unpadded) row count.
    return (-jnp.sum(partials) / jnp.float32(B)).astype(jnp.float32)


if __name__ == "__main__":
    key = jax.random.PRNGKey(0)
    k1, k2 = jax.random.split(key)

    # Small demo shapes: batch=2, seq=5, classes=32 (B=10 flattened rows,
    # deliberately not a multiple of 8 to exercise the zero-padding path).
    batch, seq, C = 2, 5, 32
    logits = jax.random.normal(k1, (batch, seq, C), dtype=jnp.float32)
    raw = jax.random.uniform(k2, (batch, seq, C), dtype=jnp.float32)
    labels = raw / jnp.sum(raw, axis=-1, keepdims=True)   # soft labels

    loss = focal_loss_with_logits(logits, labels, gamma=2.0)
    jax.block_until_ready(loss)

    # Pure-JAX reference of the same math (matches the PyTorch module).
    log_prob = jax.nn.log_softmax(logits, axis=-1)
    prob = jnp.exp(log_prob)
    f1 = (1.0 - prob) ** 2.0 * log_prob
    ref = jnp.mean(jnp.sum(-labels * f1, axis=-1))
    assert jnp.allclose(loss, ref, rtol=1e-5, atol=1e-5), (loss, ref)

    print("KERNEL_OK")
</pallas_src>

<mosaic_0001>
module attributes {stable_mosaic.version = 11 : i64} {
  func.func @_focal_loss_kernel(%arg0: i32, %arg1: i32, %arg2: memref<16x32xf32, #tpu.memory_space<vmem>>, %arg3: memref<16x32xf32, #tpu.memory_space<vmem>>, %arg4: memref<1x8x32xf32, #tpu.memory_space<vmem>>) attributes {dimension_semantics = [#tpu.dimension_semantics<parallel>, #tpu.dimension_semantics<arbitrary>], iteration_bounds = array<i64: 1, 1>, scalar_prefetch = 0 : i64, scratch_operands = 0 : i64, tpu.core_type = #tpu.core_type<tc>, window_params = [{transform_indices = @transform_0, window_bounds = array<i64: 16, 32>}, {transform_indices = @transform_1, window_bounds = array<i64: 16, 32>}, {transform_indices = @transform_2, window_bounds = array<i64: 1, 8, 32>}]} {
    %c0_i32 = arith.constant 0 : i32
    %0 = arith.cmpi eq, %arg1, %c0_i32 : i32
    %1 = arith.extui %0 : i1 to i32
    %c0_i32_0 = arith.constant 0 : i32
    %2 = arith.cmpi ne, %1, %c0_i32_0 : i32
    scf.if %2 {
      %cst_12 = arith.constant 0.000000e+00 : f32
      %29 = vector.broadcast %cst_12 : f32 to vector<1x8x32xf32>
      %c0_13 = arith.constant 0 : index
      %c0_14 = arith.constant 0 : index
      %c0_15 = arith.constant 0 : index
      %30 = vector.load %arg4[%c0_13, %c0_14, %c0_15] : memref<1x8x32xf32, #tpu.memory_space<vmem>>, vector<1x8x32xf32>
      tpu.vector_store %arg4[%c0_13, %c0_14, %c0_15], %29 {strides = array<i32>} : memref<1x8x32xf32, #tpu.memory_space<vmem>>, vector<1x8x32xf32>,
    } else {
    }
    %c0 = arith.constant 0 : index
    %c0_1 = arith.constant 0 : index
    %3 = vector.load %arg2[%c0, %c0_1] : memref<16x32xf32, #tpu.memory_space<vmem>>, vector<16x32xf32>
    %c0_2 = arith.constant 0 : index
    %c0_3 = arith.constant 0 : index
    %4 = vector.load %arg3[%c0_2, %c0_3] : memref<16x32xf32, #tpu.memory_space<vmem>>, vector<16x32xf32>
    %cst = arith.constant dense<0xFF800000> : vector<16xf32>
    %5 = vector.multi_reduction <maximumf>, %3, %cst [1] : vector<16x32xf32> to vector<16xf32>
    %6 = vector.shape_cast %5 : vector<16xf32> to vector<16x1xf32>
    %7 = vector.broadcast %6 : vector<16x1xf32> to vector<16x32xf32>
    %8 = arith.subf %3, %7 : vector<16x32xf32>
    %9 = math.exp %8 : vector<16x32xf32>
    %cst_4 = arith.constant dense<0.000000e+00> : vector<16xf32>
    %10 = vector.multi_reduction <add>, %9, %cst_4 [1] : vector<16x32xf32> to vector<16xf32>
    %11 = vector.shape_cast %10 : vector<16xf32> to vector<16x1xf32>
    %12 = math.log %11 : vector<16x1xf32>
    %13 = vector.broadcast %12 : vector<16x1xf32> to vector<16x32xf32>
    %14 = arith.subf %8, %13 : vector<16x32xf32>
    %15 = tpu.reciprocal %11 : vector<16x1xf32> -> vector<16x1xf32>
    %16 = vector.broadcast %11 : vector<16x1xf32> to vector<16x32xf32>
    %17 = arith.subf %16, %9 : vector<16x32xf32>
    %18 = vector.broadcast %15 : vector<16x1xf32> to vector<16x32xf32>
    %19 = arith.mulf %17, %18 : vector<16x32xf32>
    %20 = arith.mulf %19, %19 : vector<16x32xf32>
    %21 = arith.mulf %20, %14 : vector<16x32xf32>
    %22 = arith.mulf %4, %21 : vector<16x32xf32>
    %23 = vector.shape_cast %22 : vector<16x32xf32> to vector<2x8x32xf32>
    %cst_5 = arith.constant dense<0.000000e+00> : vector<8x32xf32>
    %24 = vector.multi_reduction <add>, %23, %cst_5 [0] : vector<2x8x32xf32> to vector<8x32xf32>
    %c0_6 = arith.constant 0 : index
    %c0_7 = arith.constant 0 : index
    %c0_8 = arith.constant 0 : index
    %25 = vector.load %arg4[%c0_6, %c0_7, %c0_8] : memref<1x8x32xf32, #tpu.memory_space<vmem>>, vector<1x8x32xf32>
    %26 = vector.shape_cast %24 : vector<8x32xf32> to vector<1x8x32xf32>
    %27 = arith.addf %25, %26 : vector<1x8x32xf32>
    %c0_9 = arith.constant 0 : index
    %c0_10 = arith.constant 0 : index
    %c0_11 = arith.constant 0 : index
    %28 = vector.load %arg4[%c0_9, %c0_10, %c0_11] : memref<1x8x32xf32, #tpu.memory_space<vmem>>, vector<1x8x32xf32>
    tpu.vector_store %arg4[%c0_9, %c0_10, %c0_11], %27 {strides = array<i32>} : memref<1x8x32xf32, #tpu.memory_space<vmem>>, vector<1x8x32xf32>,
    return
  }
  func.func @transform_0(%arg0: i32, %arg1: i32) -> (i32, i32) {
    %c1_i32 = arith.constant 1 : i32
    %0 = arith.muli %arg0, %c1_i32 : i32
    %1 = arith.addi %0, %arg1 : i32
    %c0_i32 = arith.constant 0 : i32
    %c0_i32_0 = arith.constant 0 : i32
    return %1, %c0_i32 : i32, i32
  }
  func.func @transform_1(%arg0: i32, %arg1: i32) -> (i32, i32) {
    %c1_i32 = arith.constant 1 : i32
    %0 = arith.muli %arg0, %c1_i32 : i32
    %1 = arith.addi %0, %arg1 : i32
    %c0_i32 = arith.constant 0 : i32
    %c0_i32_0 = arith.constant 0 : i32
    return %1, %c0_i32 : i32, i32
  }
  func.func @transform_2(%arg0: i32, %arg1: i32) -> (i32, i32, i32) {
    %c0_i32 = arith.constant 0 : i32
    %c0_i32_0 = arith.constant 0 : i32
    %c0_i32_1 = arith.constant 0 : i32
    return %arg0, %c0_i32, %c0_i32_0 : i32, i32, i32
  }
}

</mosaic_0001>

<bundles_post_ra>
// kernel: tpu_custom_call.1
= control target key start
LH: loop header
LB: loop body
LE: loop exit
PB: predicated region body
PF: predicated region fallthrough
CT: control target
= control target key end

     0   :  { %7 = vsyncpa [#allocation3], 0  ;;  %s243_s0 = inlined_call_operand.hbm [shape: f32[16,32], index: 0, kind: input, shape index: {}]   ;;  %s244_s1 = inlined_call_operand.hbm [shape: f32[16,32], index: 1, kind: input, shape index: {}]   ;;  %s245_s2 = inlined_call_operand.hbm [shape: f32[1,8,32], index: 2, kind: output, shape index: {}]  }
   0x1   :  { %8 = vsyncpa [#allocation6], 0 }
   0x2   :  { %9 = vsyncpa [#allocation4], 0  ;;  %s205_s9 = smov [#allocation2]  }
   0x3   :  { %s19_s10 = sshll.u32 %s205_s9, 4  ;;  %s20_s10 = int_to_ptr.vmem [resolvable:$true] %s19_s10 }
   0x4   :  { %s147_s11 = scalar_lea.vmem %s20_s10, 256  ;;  %p152_p1 = scmp.lt.s32.totalorder %s20_s10, %s20_s10 }
   0x5   :  { %p148_p0 = scmp.ne.s32.totalorder %s20_s10, %s147_s11  ;;  %p153_p2 = scmp.lt.s32.totalorder %s147_s11, %s147_s11 }
   0x7   :  { %p154_p3 = por %p153_p2, %p152_p1 }
   0x9   :  { %p155_p4 = pnand %p154_p3, %p148_p0 }
   0xb   :  { %158 = shalt.err (!%p155_p4)
}
   0xc   :  { %s206_s12 = smov 128   ;;  %s207_s13 = smov 8  }
   0xd   :  { %25 = dma.hbm_to_vmem [thread:$0]  %s243_s0, 256, %s20_s10, [#allocation3], %s206_s12, %s206_s12, %s207_s13  }
   0xe   :  { %s208_s16 = smov [#allocation5]  }
   0xf   :  { %s35_s17 = sshll.u32 %s208_s16, 4  ;;  %s36_s17 = int_to_ptr.vmem [resolvable:$true] %s35_s17 }
  0x10   :  { %s167_s18 = scalar_lea.vmem %s36_s17, 256  ;;  %p172_p6 = scmp.lt.s32.totalorder %s36_s17, %s36_s17 }
  0x11   :  { %p168_p5 = scmp.ne.s32.totalorder %s36_s17, %s167_s18  ;;  %p173_p7 = scmp.lt.s32.totalorder %s167_s18, %s167_s18 }
  0x13   :  { %p174_p8 = por %p173_p7, %p172_p6 }
  0x15   :  { %p175_p9 = pnand %p174_p8, %p168_p5 }
  0x17   :  { %178 = shalt.err (!%p175_p9)
}
  0x18   :  { %41 = dma.hbm_to_vmem [thread:$0]  %s244_s1, 256, %s36_s17, [#allocation6], %s206_s12, %s206_s12, %s207_s13  }
  0x19   :  { %199 = dma.done.wait [#allocation3], 256  }
  0x1a   :  { %200 = vsyncadd [#allocation3], 4294967040 }
  0x1b   :  { %201 = dma.done.wait [#allocation6], 256  }
  0x1c   :  { %202 = vsyncadd [#allocation6], 4294967040  ;;  %vm56_vm0 = vcmask 261120   ;;  %v58_v0 = vld [vmem:[#allocation2] sm:$0xff]  ;;  %v59_v1 = vld [vmem:[#allocation2 + $0x8] sm:$0xff]  ;;  %v209_v14 = vmov 0.0  }
  0x1d   :  { %v63_v2 = vsel %vm56_vm0, %v58_v0, -inf  ;;  %v66_v3 = vsel %vm56_vm0, %v59_v1, -inf  ;;  %57 = vst.msk [vmem:[#allocation7] sm:$0xff] %vm56_vm0, %v209_v14  ;;  %v60_v30 = vld [vmem:[#allocation5] sm:$0xff]  ;;  %v61_v33 = vld [vmem:[#allocation5 + $0x8] sm:$0xff]  ;;  %s210_s0 = smov [#allocation7]  }
  0x1e   :  { %64 = vmax.xlane.f32.xlu0 %v63_v2  ;;  %s111_s1 = sshll.u32 %s210_s0, 4  ;;  %s112_s1 = int_to_ptr.vmem [resolvable:$true] %s111_s1 }
  0x1f   :  { %s179_s21 = scalar_lea.vmem %s112_s1, 128  ;;  %p184_p11 = scmp.lt.s32.totalorder %s112_s1, %s112_s1 }
  0x20   :  { %p180_p10 = scmp.ne.s32.totalorder %s112_s1, %s179_s21  ;;  %p185_p12 = scmp.lt.s32.totalorder %s179_s21, %s179_s21 }
  0x22   :  { %67 = vmax.xlane.f32.xlu0 %v66_v3  ;;  %p186_p13 = por %p185_p12, %p184_p11 }
  0x24   :  { %v102_v39 = vld [vmem:[#allocation7] sm:$0xff]  ;;  %p187_p0 = pnand %p186_p13, %p180_p10 }
  0xa7   :  { %v65_v4 = vpop.xlane.xlu0 %64 }
  0xa8   :  { %v69_v5 = vsub.f32 %v58_v0, %v65_v4 }
  0xaa   :  { %v71_v6 = vmul.f32 1.442695, %v69_v5 }
  0xab   :  { %v68_v7 = vpop.xlane.xlu0 %67 }
  0xac   :  { %127 = vpow2.f32 %v71_v6  ;;  %v70_v8 = vsub.f32 %v59_v1, %v68_v7 }
  0xae   :  { %v73_v9 = vmul.f32 1.442695, %v70_v8 }
  0xb0   :  { %129 = vpow2.f32 %v73_v9 }
  0xb9   :  { %v128_v10 = vpop.eup %127 }
  0xba   :  { %v75_v11 = vsel %vm56_vm0, %v128_v10, 0.0 }
  0xbb   :  { %76 = vadd.xlane.f32.xlu1 %v75_v11 }
  0xbd   :  { %v130_v12 = vpop.eup %129 }
  0xbe   :  { %v78_v13 = vsel %vm56_vm0, %v130_v12, 0.0 }
  0xbf   :  { %79 = vadd.xlane.f32.xlu1 %v78_v13 }
 0x144   :  { %v77_v15 = vpop.xlane.xlu1 %76 }
 0x145   :  { %131 = vlog2.f32 %v77_v15  ;;  %v89_v18 = vsub.f32 %v77_v15, %v128_v10 }
 0x146   :  { %133 = vrcp.f32 %v77_v15 }
 0x148   :  { %v80_v16 = vpop.xlane.xlu1 %79 }
 0x149   :  { %135 = vlog2.f32 %v80_v16  ;;  %v90_v25 = vsub.f32 %v80_v16, %v130_v12 }
 0x14a   :  { %137 = vrcp.f32 %v80_v16 }
 0x152   :  { %v132_v17 = vpop.eup %131 }
 0x153   :  { %v134_v19 = vpop.eup %133  ;;  %v82_v20 = vmul.f32 0.6931472, %v132_v17 }
 0x154   :  { %v91_v21 = vmul.f32 %v134_v19, %v89_v18 }
 0x155   :  { %v85_v22 = vsub.f32 %v69_v5, %v82_v20 }
 0x156   :  { %v136_v23 = vpop.eup %135  ;;  %v93_v24 = vmul.f32 %v91_v21, %v91_v21 }
 0x157   :  { %v138_v26 = vpop.eup %137  ;;  %v84_v27 = vmul.f32 0.6931472, %v136_v23 }
 0x158   :  { %v95_v28 = vmul.f32 %v93_v24, %v85_v22  ;;  %v92_v29 = vmul.f32 %v138_v26, %v90_v25 }
 0x159   :  { %v86_v31 = vsub.f32 %v70_v8, %v84_v27 }
 0x15a   :  { %v94_v32 = vmul.f32 %v92_v29, %v92_v29  ;;  %v97_v34 = vmul.f32 %v95_v28, %v60_v30 }
 0x15c   :  { %v96_v35 = vmul.f32 %v94_v32, %v86_v31  ;;  %v99_v38 = vsel %vm56_vm0, %v97_v34, 0.0 }
 0x15e   :  { %v98_v36 = vmul.f32 %v96_v35, %v61_v33 }
 0x160   :  { %v100_v37 = vsel %vm56_vm0, %v98_v36, 0.0 }
 0x161   :  { %v101_v40 = vadd.f32 %v100_v37, %v99_v38 }
 0x163   :  { %v103_v41 = vadd.f32 %v102_v39, %v101_v40 }
 0x165   :  { %104 = vst.msk [vmem:[#allocation7] sm:$0xff] %vm56_vm0, %v103_v41 }
 0x166   :  { %190 = shalt.err (!%p187_p0)
}
 0x167   :  { %114 = dma.vmem_to_hbm [thread:$0]  %s112_s1, 128, %s245_s2, [#allocation4]  }
 0x168   :  { %203 = dma.done.wait [#allocation4], 128  }
 0x169   :  { %204 = vsyncadd [#allocation4], 4294967168 }
 0x16a   :  { %118 = vsyncpa [#allocation3], 1 }
 0x16b   :  { %119 = vsyncpa [#allocation6], 1 }
 0x16c   :  { %120 = vsyncpa [#allocation4], 1 }

</bundles_post_ra>
